<compile_context>
chip_gen: v6e
topology: v6e:2x2x1
jax: 0.10.0
libtpu: 0.0.40
codegen_flags: <defaults>
</compile_context>

<pallas_src>
import jax
import jax.numpy as jnp
from jax import lax
from jax.experimental import pallas as pl
from jax.experimental.pallas import tpu as pltpu


def _dot_predictor_kernel(tok_ref, waf_ref, ba_ref,
                          ds_ref, w1_ref, b1_ref, w2_ref, b2_ref,
                          out_ref):
    seq, tm = tok_ref.shape          # (S, TM)
    vocab = waf_ref.shape[1]         # waf_ref: (H, V)

    # --- ArchitectureEncoder: embedding mean-pool as one-hot counts @ fused weight ---
    # counts^T[v, b] = #{s : tok[s, b] == v}; small dim V on sublanes, batch on lanes.
    tok = tok_ref[...]                                              # (S, TM) int32
    vocab_iota = lax.broadcasted_iota(jnp.int32, (vocab, tm), 0)    # (V, TM)
    counts = jnp.zeros((vocab, tm), jnp.int32)
    for s in range(seq):                                            # static unroll, S is tiny
        counts = counts + (tok[s:s + 1, :] == vocab_iota).astype(jnp.int32)

    # out_arch^T = W_af^T @ counts^T + b_arch^T   (W_af already pre-scaled by 1/seq)
    out_arch = jnp.dot(waf_ref[...], counts.astype(jnp.float32),
                       preferred_element_type=jnp.float32) + ba_ref[...]      # (H, TM)

    # --- DatasetEncoder: relu(W1^T x^T + b1^T), then W2^T h + b2^T ---
    h = jnp.maximum(
        jnp.dot(w1_ref[...], ds_ref[...],
                preferred_element_type=jnp.float32) + b1_ref[...], 0.0)       # (Dh, TM)
    out_dataset = jnp.dot(w2_ref[...], h,
                          preferred_element_type=jnp.float32) + b2_ref[...]   # (H, TM)

    # --- torch.mul + torch.sum(dim=1): original rows are columns here -> sublane reduce ---
    prod = out_arch * out_dataset                                   # (H, TM)
    out_ref[...] = jnp.sum(prod, axis=0, keepdims=True)             # (1, TM), lane-dense


def dot_predictor(arch_tokens, embed_table, w_arch, b_arch,
                  dataset_feature, w1, b1, w2, b2, *, block_b=256):
    assert block_b % 128 == 0 and block_b >= 128
    B, S = arch_tokens.shape
    V, E = embed_table.shape
    H = w_arch.shape[1]
    D_in = dataset_feature.shape[1]
    Dh = w1.shape[1]

    # Batch tile: multiple of 128, capped at block_b, and sized so the grid has >= 2 steps
    # whenever B >= 256 (v7x megacore sharding of the "parallel" batch axis).
    half = (((B + 1) // 2) + 127) // 128 * 128
    tm = max(128, min(block_b, half))
    b_pad = pl.cdiv(B, tm) * tm

    # Transposed, padded activations: batch on the last (lane) axis.
    tok_t = arch_tokens.T                                  # (S, B) int32
    ds_t = dataset_feature.T                               # (D_in, B)
    if b_pad != B:
        tok_t = jnp.pad(tok_t, ((0, 0), (0, b_pad - B)))
        ds_t = jnp.pad(ds_t, ((0, 0), (0, b_pad - B)))

    # Fused + pre-transposed parameters (done once at trace time).
    waf_t = ((embed_table @ w_arch) * (1.0 / S)).T         # (H, V)
    ba_t = b_arch.reshape(1, H).T                          # (H, 1)
    w1_t = w1.T                                            # (Dh, D_in)
    b1_t = b1.reshape(1, Dh).T                             # (Dh, 1)
    w2_t = w2.T                                            # (H, Dh)
    b2_t = b2.reshape(1, H).T                              # (H, 1)

    def resident(shape):
        # Same block index every grid step -> stays VMEM-resident, DMA'd once.
        return pl.BlockSpec(shape, lambda i: (0, 0))

    out = pl.pallas_call(
        _dot_predictor_kernel,
        out_shape=jax.ShapeDtypeStruct((1, b_pad), jnp.float32),
        grid_spec=pltpu.PrefetchScalarGridSpec(
            num_scalar_prefetch=0,
            grid=(b_pad // tm,),
            in_specs=[
                pl.BlockSpec((S, tm), lambda i: (0, i)),       # token ids (streamed)
                resident((H, V)),                              # fused arch weight (pre-scaled)
                resident((H, 1)),                              # arch head bias
                pl.BlockSpec((D_in, tm), lambda i: (0, i)),    # dataset features (streamed)
                resident((Dh, D_in)),                          # dataset W1^T
                resident((Dh, 1)),                             # dataset b1^T
                resident((H, Dh)),                             # dataset W2^T
                resident((H, 1)),                              # dataset b2^T
            ],
            out_specs=pl.BlockSpec((1, tm), lambda i: (0, i)),
        ),
        compiler_params=pltpu.CompilerParams(
            dimension_semantics=("parallel",),                 # v7x: shard batch over 2 TCs
            vmem_limit_bytes=32 * 1024 * 1024,
        ),
    )(tok_t, waf_t, ba_t, ds_t, w1_t, b1_t, w2_t, b2_t)

    return out[:, :B].T                                        # (B, 1), matches keepdim=True


def dot_predictor_ref(arch_tokens, embed_table, w_arch, b_arch,
                      dataset_feature, w1, b1, w2, b2):
    pooled = jnp.mean(embed_table[arch_tokens], axis=1)
    out_arch = pooled @ w_arch + b_arch
    out_dataset = jnp.maximum(dataset_feature @ w1 + b1, 0.0) @ w2 + b2
    return jnp.sum(out_arch * out_dataset, axis=1, keepdims=True)


if __name__ == "__main__":
    # Small shapes consistent with the module's constructor arguments.
    arch_num = 10            # architecture-token vocabulary
    arch_embed_dim = 16
    hidden_dim = 32          # shared output dim of both encoders (== dataset_out_dim)
    dataset_input_dim = 24
    dataset_hid_dim = 48
    batch = 2
    seq = 8                  # number of architecture tokens

    key = jax.random.PRNGKey(0)
    k_tok, k_emb, k_wa, k_ba, k_ds, k_w1, k_b1, k_w2, k_b2 = jax.random.split(key, 9)

    embed_table = jax.random.normal(k_emb, (arch_num, arch_embed_dim), jnp.float32) * 0.1
    w_arch = jax.random.normal(k_wa, (arch_embed_dim, hidden_dim), jnp.float32) * 0.1
    b_arch = jax.random.normal(k_ba, (1, hidden_dim), jnp.float32) * 0.1
    w1 = jax.random.normal(k_w1, (dataset_input_dim, dataset_hid_dim), jnp.float32) * 0.1
    b1 = jax.random.normal(k_b1, (1, dataset_hid_dim), jnp.float32) * 0.1
    w2 = jax.random.normal(k_w2, (dataset_hid_dim, hidden_dim), jnp.float32) * 0.1
    b2 = jax.random.normal(k_b2, (1, hidden_dim), jnp.float32) * 0.1

    arch_input = jax.random.randint(k_tok, (batch, seq), 0, arch_num, dtype=jnp.int32)
    dataset_feature = jax.random.normal(k_ds, (batch, dataset_input_dim), jnp.float32)

    out = dot_predictor(arch_input, embed_table, w_arch, b_arch,
                        dataset_feature, w1, b1, w2, b2)
    out = jax.block_until_ready(out)

    ref = dot_predictor_ref(arch_input, embed_table, w_arch, b_arch,
                            dataset_feature, w1, b1, w2, b2)
    assert out.shape == (batch, 1)
    assert jnp.allclose(out, ref, atol=1e-4, rtol=1e-4), (out, ref)
    print("KERNEL_OK")
</pallas_src>

<mosaic_0001>
module attributes {stable_mosaic.version = 11 : i64} {
  func.func @_dot_predictor_kernel(%arg0: i32, %arg1: memref<8x128xi32, #tpu.memory_space<vmem>>, %arg2: memref<32x10xf32, #tpu.memory_space<vmem>>, %arg3: memref<32x1xf32, #tpu.memory_space<vmem>>, %arg4: memref<24x128xf32, #tpu.memory_space<vmem>>, %arg5: memref<48x24xf32, #tpu.memory_space<vmem>>, %arg6: memref<48x1xf32, #tpu.memory_space<vmem>>, %arg7: memref<32x48xf32, #tpu.memory_space<vmem>>, %arg8: memref<32x1xf32, #tpu.memory_space<vmem>>, %arg9: memref<1x128xf32, #tpu.memory_space<vmem>>) attributes {dimension_semantics = [#tpu.dimension_semantics<parallel>], iteration_bounds = array<i64: 1>, scalar_prefetch = 0 : i64, scratch_operands = 0 : i64, tpu.core_type = #tpu.core_type<tc>, window_params = [{transform_indices = @transform_0, window_bounds = array<i64: 8, 128>}, {pipeline_mode = #tpu.pipeline_mode<synchronous>, transform_indices = @transform_1, window_bounds = array<i64: 32, 10>}, {pipeline_mode = #tpu.pipeline_mode<synchronous>, transform_indices = @transform_2, window_bounds = array<i64: 32, 1>}, {transform_indices = @transform_3, window_bounds = array<i64: 24, 128>}, {pipeline_mode = #tpu.pipeline_mode<synchronous>, transform_indices = @transform_4, window_bounds = array<i64: 48, 24>}, {pipeline_mode = #tpu.pipeline_mode<synchronous>, transform_indices = @transform_5, window_bounds = array<i64: 48, 1>}, {pipeline_mode = #tpu.pipeline_mode<synchronous>, transform_indices = @transform_6, window_bounds = array<i64: 32, 48>}, {pipeline_mode = #tpu.pipeline_mode<synchronous>, transform_indices = @transform_7, window_bounds = array<i64: 32, 1>}, {transform_indices = @transform_8, window_bounds = array<i64: 1, 128>}]} {
    %c0 = arith.constant 0 : index
    %c0_0 = arith.constant 0 : index
    %0 = vector.load %arg1[%c0, %c0_0] : memref<8x128xi32, #tpu.memory_space<vmem>>, vector<8x128xi32>
    %1 = tpu.iota {dimensions = array<i32: 0>} : vector<10x128xi32>
    %c0_i32 = arith.constant 0 : i32
    %2 = vector.broadcast %c0_i32 : i32 to vector<10x128xi32>
    %3 = vector.extract_strided_slice %0 {offsets = [0, 0], sizes = [1, 128], strides = [1, 1]} : vector<8x128xi32> to vector<1x128xi32>
    %4 = vector.broadcast %3 : vector<1x128xi32> to vector<10x128xi32>
    %5 = arith.cmpi eq, %4, %1 : vector<10x128xi32>
    %6 = arith.extui %5 : vector<10x128xi1> to vector<10x128xi32>
    %7 = arith.addi %2, %6 : vector<10x128xi32>
    %8 = vector.extract_strided_slice %0 {offsets = [1, 0], sizes = [1, 128], strides = [1, 1]} : vector<8x128xi32> to vector<1x128xi32>
    %9 = vector.broadcast %8 : vector<1x128xi32> to vector<10x128xi32>
    %10 = arith.cmpi eq, %9, %1 : vector<10x128xi32>
    %11 = arith.extui %10 : vector<10x128xi1> to vector<10x128xi32>
    %12 = arith.addi %7, %11 : vector<10x128xi32>
    %13 = vector.extract_strided_slice %0 {offsets = [2, 0], sizes = [1, 128], strides = [1, 1]} : vector<8x128xi32> to vector<1x128xi32>
    %14 = vector.broadcast %13 : vector<1x128xi32> to vector<10x128xi32>
    %15 = arith.cmpi eq, %14, %1 : vector<10x128xi32>
    %16 = arith.extui %15 : vector<10x128xi1> to vector<10x128xi32>
    %17 = arith.addi %12, %16 : vector<10x128xi32>
    %18 = vector.extract_strided_slice %0 {offsets = [3, 0], sizes = [1, 128], strides = [1, 1]} : vector<8x128xi32> to vector<1x128xi32>
    %19 = vector.broadcast %18 : vector<1x128xi32> to vector<10x128xi32>
    %20 = arith.cmpi eq, %19, %1 : vector<10x128xi32>
    %21 = arith.extui %20 : vector<10x128xi1> to vector<10x128xi32>
    %22 = arith.addi %17, %21 : vector<10x128xi32>
    %23 = vector.extract_strided_slice %0 {offsets = [4, 0], sizes = [1, 128], strides = [1, 1]} : vector<8x128xi32> to vector<1x128xi32>
    %24 = vector.broadcast %23 : vector<1x128xi32> to vector<10x128xi32>
    %25 = arith.cmpi eq, %24, %1 : vector<10x128xi32>
    %26 = arith.extui %25 : vector<10x128xi1> to vector<10x128xi32>
    %27 = arith.addi %22, %26 : vector<10x128xi32>
    %28 = vector.extract_strided_slice %0 {offsets = [5, 0], sizes = [1, 128], strides = [1, 1]} : vector<8x128xi32> to vector<1x128xi32>
    %29 = vector.broadcast %28 : vector<1x128xi32> to vector<10x128xi32>
    %30 = arith.cmpi eq, %29, %1 : vector<10x128xi32>
    %31 = arith.extui %30 : vector<10x128xi1> to vector<10x128xi32>
    %32 = arith.addi %27, %31 : vector<10x128xi32>
    %33 = vector.extract_strided_slice %0 {offsets = [6, 0], sizes = [1, 128], strides = [1, 1]} : vector<8x128xi32> to vector<1x128xi32>
    %34 = vector.broadcast %33 : vector<1x128xi32> to vector<10x128xi32>
    %35 = arith.cmpi eq, %34, %1 : vector<10x128xi32>
    %36 = arith.extui %35 : vector<10x128xi1> to vector<10x128xi32>
    %37 = arith.addi %32, %36 : vector<10x128xi32>
    %38 = vector.extract_strided_slice %0 {offsets = [7, 0], sizes = [1, 128], strides = [1, 1]} : vector<8x128xi32> to vector<1x128xi32>
    %39 = vector.broadcast %38 : vector<1x128xi32> to vector<10x128xi32>
    %40 = arith.cmpi eq, %39, %1 : vector<10x128xi32>
    %41 = arith.extui %40 : vector<10x128xi1> to vector<10x128xi32>
    %42 = arith.addi %37, %41 : vector<10x128xi32>
    %c0_1 = arith.constant 0 : index
    %c0_2 = arith.constant 0 : index
    %43 = vector.load %arg2[%c0_1, %c0_2] : memref<32x10xf32, #tpu.memory_space<vmem>>, vector<32x10xf32>
    %44 = arith.sitofp %42 : vector<10x128xi32> to vector<10x128xf32>
    %cst = arith.constant dense<0.000000e+00> : vector<32x128xf32>
    %45 = tpu.matmul %43, %44, %cst {dimension_numbers = #tpu.dot_dimension_numbers<[1], [0], [0], [1], [0, 0, 1, 1], [], []>} : vector<32x10xf32>, vector<10x128xf32>, vector<32x128xf32> -> vector<32x128xf32>
    %c0_3 = arith.constant 0 : index
    %c0_4 = arith.constant 0 : index
    %46 = vector.load %arg3[%c0_3, %c0_4] : memref<32x1xf32, #tpu.memory_space<vmem>>, vector<32x1xf32>
    %47 = vector.broadcast %46 : vector<32x1xf32> to vector<32x128xf32>
    %48 = arith.addf %45, %47 : vector<32x128xf32>
    %c0_5 = arith.constant 0 : index
    %c0_6 = arith.constant 0 : index
    %49 = vector.load %arg5[%c0_5, %c0_6] : memref<48x24xf32, #tpu.memory_space<vmem>>, vector<48x24xf32>
    %c0_7 = arith.constant 0 : index
    %c0_8 = arith.constant 0 : index
    %50 = vector.load %arg4[%c0_7, %c0_8] : memref<24x128xf32, #tpu.memory_space<vmem>>, vector<24x128xf32>
    %cst_9 = arith.constant dense<0.000000e+00> : vector<48x128xf32>
    %51 = tpu.matmul %49, %50, %cst_9 {dimension_numbers = #tpu.dot_dimension_numbers<[1], [0], [0], [1], [0, 0, 1, 1], [], []>} : vector<48x24xf32>, vector<24x128xf32>, vector<48x128xf32> -> vector<48x128xf32>
    %c0_10 = arith.constant 0 : index
    %c0_11 = arith.constant 0 : index
    %52 = vector.load %arg6[%c0_10, %c0_11] : memref<48x1xf32, #tpu.memory_space<vmem>>, vector<48x1xf32>
    %53 = vector.broadcast %52 : vector<48x1xf32> to vector<48x128xf32>
    %54 = arith.addf %51, %53 : vector<48x128xf32>
    %cst_12 = arith.constant 0.000000e+00 : f32
    %55 = vector.broadcast %cst_12 : f32 to vector<48x128xf32>
    %56 = arith.maximumf %54, %55 : vector<48x128xf32>
    %c0_13 = arith.constant 0 : index
    %c0_14 = arith.constant 0 : index
    %57 = vector.load %arg7[%c0_13, %c0_14] : memref<32x48xf32, #tpu.memory_space<vmem>>, vector<32x48xf32>
    %cst_15 = arith.constant dense<0.000000e+00> : vector<32x128xf32>
    %58 = tpu.matmul %57, %56, %cst_15 {dimension_numbers = #tpu.dot_dimension_numbers<[1], [0], [0], [1], [0, 0, 1, 1], [], []>} : vector<32x48xf32>, vector<48x128xf32>, vector<32x128xf32> -> vector<32x128xf32>
    %c0_16 = arith.constant 0 : index
    %c0_17 = arith.constant 0 : index
    %59 = vector.load %arg8[%c0_16, %c0_17] : memref<32x1xf32, #tpu.memory_space<vmem>>, vector<32x1xf32>
    %60 = vector.broadcast %59 : vector<32x1xf32> to vector<32x128xf32>
    %61 = arith.addf %58, %60 : vector<32x128xf32>
    %62 = arith.mulf %48, %61 : vector<32x128xf32>
    %cst_18 = arith.constant dense<0.000000e+00> : vector<128xf32>
    %63 = vector.multi_reduction <add>, %62, %cst_18 [0] : vector<32x128xf32> to vector<128xf32>
    %64 = vector.shape_cast %63 : vector<128xf32> to vector<1x128xf32>
    %c0_19 = arith.constant 0 : index
    %c0_20 = arith.constant 0 : index
    %65 = vector.load %arg9[%c0_19, %c0_20] : memref<1x128xf32, #tpu.memory_space<vmem>>, vector<1x128xf32>
    tpu.vector_store %arg9[%c0_19, %c0_20], %64 {strides = array<i32>} : memref<1x128xf32, #tpu.memory_space<vmem>>, vector<1x128xf32>,
    return
  }
  func.func @transform_0(%arg0: i32) -> (i32, i32) {
    %c0_i32 = arith.constant 0 : i32
    %c0_i32_0 = arith.constant 0 : i32
    return %c0_i32, %arg0 : i32, i32
  }
  func.func @transform_1(%arg0: i32) -> (i32, i32) {
    %c0_i32 = arith.constant 0 : i32
    %c0_i32_0 = arith.constant 0 : i32
    %c0_i32_1 = arith.constant 0 : i32
    return %c0_i32, %c0_i32_0 : i32, i32
  }
  func.func @transform_2(%arg0: i32) -> (i32, i32) {
    %c0_i32 = arith.constant 0 : i32
    %c0_i32_0 = arith.constant 0 : i32
    %c0_i32_1 = arith.constant 0 : i32
    return %c0_i32, %c0_i32_0 : i32, i32
  }
  func.func @transform_3(%arg0: i32) -> (i32, i32) {
    %c0_i32 = arith.constant 0 : i32
    %c0_i32_0 = arith.constant 0 : i32
    return %c0_i32, %arg0 : i32, i32
  }
  func.func @transform_4(%arg0: i32) -> (i32, i32) {
    %c0_i32 = arith.constant 0 : i32
    %c0_i32_0 = arith.constant 0 : i32
    %c0_i32_1 = arith.constant 0 : i32
    return %c0_i32, %c0_i32_0 : i32, i32
  }
  func.func @transform_5(%arg0: i32) -> (i32, i32) {
    %c0_i32 = arith.constant 0 : i32
    %c0_i32_0 = arith.constant 0 : i32
    %c0_i32_1 = arith.constant 0 : i32
    return %c0_i32, %c0_i32_0 : i32, i32
  }
  func.func @transform_6(%arg0: i32) -> (i32, i32) {
    %c0_i32 = arith.constant 0 : i32
    %c0_i32_0 = arith.constant 0 : i32
    %c0_i32_1 = arith.constant 0 : i32
    return %c0_i32, %c0_i32_0 : i32, i32
  }
  func.func @transform_7(%arg0: i32) -> (i32, i32) {
    %c0_i32 = arith.constant 0 : i32
    %c0_i32_0 = arith.constant 0 : i32
    %c0_i32_1 = arith.constant 0 : i32
    return %c0_i32, %c0_i32_0 : i32, i32
  }
  func.func @transform_8(%arg0: i32) -> (i32, i32) {
    %c0_i32 = arith.constant 0 : i32
    %c0_i32_0 = arith.constant 0 : i32
    return %c0_i32, %arg0 : i32, i32
  }
}

</mosaic_0001>

<bundles_post_ra>
// kernel: tpu_custom_call.1
= control target key start
LH: loop header
LB: loop body
LE: loop exit
PB: predicated region body
PF: predicated region fallthrough
CT: control target
= control target key end

     0   :  { %vm289_vm0 = vcmask 195584   ;;  %v31_v2 = vlaneseq  ;;  %vm142_vm1 = vcmask 80896   ;;  %v684_v4 = vmov 0   ;;  %s891_s0 = inlined_call_operand.vmem [shape: s32[8,128], index: 0, kind: input, shape index: {}]   ;;  %s892_s1 = inlined_call_operand.vmem [shape: f32[32,10], index: 1, kind: input, shape index: {}]   ;;  %s893_s2 = inlined_call_operand.vmem [shape: f32[32,1], index: 2, kind: input, shape index: {}]   ;;  %s894_s3 = inlined_call_operand.vmem [shape: f32[24,128], index: 3, kind: input, shape index: {}]   ;;  %s895_s4 = inlined_call_operand.vmem [shape: f32[48,24], index: 4, kind: input, shape index: {}]   ;;  %s896_s5 = inlined_call_operand.vmem [shape: f32[48,1], index: 5, kind: input, shape index: {}]   ;;  %s897_s6 = inlined_call_operand.vmem [shape: f32[32,48], index: 6, kind: input, shape index: {}]   ;;  %s898_s7 = inlined_call_operand.vmem [shape: f32[32,1], index: 7, kind: input, shape index: {}]   ;;  %s899_s8 = inlined_call_operand.hbm [shape: f32[1,128], index: 8, kind: output, shape index: {}]  }
   0x1   :  { %v252_v0 = vld [vmem:[%s894_s3 + $0x10] sm:$0xff]  ;;  %v251_v1 = vld [vmem:[%s894_s3 + $0x8] sm:$0xff]  ;;  %v244_v3 = vld [vmem:[%s895_s4] sm:$0xff]  ;;  %660 = vset.pattern.permute.xlu0 %v684_v4  ;;  %661 = vset.pattern.permute.xlu1 %v684_v4 }
   0x2   :  { %613 = vmatprep.subr.mxu1 %v252_v0  ;;  %v250_v5 = vld [vmem:[%s894_s3] sm:$0xff]  ;;  %619 = vmatprep.mubr.msk.f32.mxu1 %vm289_vm0, %v244_v3  ;;  %v745_v6 = vshrl.u32 %v31_v2, 7  ;;  %v245_v9 = vld [vmem:[%s895_s4 + $0x8] sm:$0xff]  ;;  %v246_v14 = vld [vmem:[%s895_s4 + $0x10] sm:$0xff] }
   0x3   :  { %614 = vmatpush3.msra.mxu1 %v252_v0  ;;  %v30_v7 = vld [vmem:[%s891_s0] sm:$0xff]  ;;  %v258_v18 = vld [vmem:[%s896_s5 + $0x28] sm:$0xff]  ;;  %v256_v23 = vld [vmem:[%s896_s5 + $0x18] sm:$0xff] }
   0x4   :  { %615 = vmatprep.subr.mxu1 %v251_v1  ;;  %v112_v8 = vld [vmem:[%s892_s1] sm:$0xff]  ;;  %v758_v10 = vadd.s32 8, %v745_v6  ;;  %v36_v11 = vsub.s32 0, %v745_v6  ;;  %v44_v12 = vsub.s32 1, %v745_v6  ;;  %v54_v13 = vsub.s32 2, %v745_v6  ;;  %286 = vperm.xlu0 %660, %v258_v18   ;;  %v247_v28 = vld [vmem:[%s895_s4 + $0x18] sm:$0xff] }
   0x5   :  { %616 = vmatpush3.msra.mxu1 %v251_v1  ;;  %607 = vmatprep.mubr.msk.f32.mxu0 %vm142_vm1, %v112_v8  ;;  %v64_v15 = vsub.s32 3, %v745_v6  ;;  %v74_v16 = vsub.s32 4, %v745_v6  ;;  %v84_v17 = vsub.s32 5, %v745_v6  ;;  %v94_v22 = vsub.s32 6, %v745_v6  ;;  %v257_v27 = vld [vmem:[%s896_s5 + $0x20] sm:$0xff]  ;;  %v255_v36 = vld [vmem:[%s896_s5 + $0x10] sm:$0xff] }
   0x6   :  { %617 = vmatprep.subr.mxu1 %v250_v5  ;;  %v37_v19 = vrot.slane %v30_v7, %v36_v11  ;;  %v45_v20 = vrot.slane %v30_v7, %v44_v12  ;;  %v55_v21 = vrot.slane %v30_v7, %v54_v13  ;;  %v104_v26 = vsub.s32 7, %v745_v6  ;;  %v248_v30 = vld [vmem:[%s895_s4 + $0x20] sm:$0xff]  ;;  %276 = vperm.xlu1 %661, %v256_v23  }
   0x7   :  { %618 = vmatpush3.msra.mxu1 %v250_v5  ;;  %v65_v24 = vrot.slane %v30_v7, %v64_v15  ;;  %v75_v25 = vrot.slane %v30_v7, %v74_v16  ;;  %v85_v29 = vrot.slane %v30_v7, %v84_v17  ;;  %v95_v35 = vrot.slane %v30_v7, %v94_v22 }
   0x8   :  { %620 = vmatmul.mubr.msk.f32.vlgmr.msra.gmra.mxu1 %vm289_vm0, %v245_v9  ;;  %vm39_vm2 = vcmp.eq.s32.totalorder %v37_v19, %v758_v10  ;;  %vm47_vm3 = vcmp.eq.s32.totalorder %v45_v20, %v758_v10  ;;  %vm57_vm4 = vcmp.eq.s32.totalorder %v55_v21, %v758_v10  ;;  %281 = vperm.xlu0 %660, %v257_v27  }
   0x9   :  { %622 = vmatprep.mubr.msk.f32.mxu1 %vm289_vm0, %v246_v14  ;;  %v41_v31 = vsel %vm39_vm2, 1, %v684_v4  ;;  %v49_v32 = vsel %vm47_vm3, 1, %v684_v4  ;;  %v59_v33 = vsel %vm57_vm4, 1, %v684_v4  ;;  %vm67_vm5 = vcmp.eq.s32.totalorder %v65_v24, %v758_v10 }
   0xa   :  { %v51_v34 = vadd.s32 %v49_v32, %v41_v31  ;;  %vm77_vm6 = vcmp.eq.s32.totalorder %v75_v25, %v758_v10 }
   0xb   :  { %13 = vsyncpa [#allocation3], 0  ;;  %v69_v37 = vsel %vm67_vm5, 1, %v684_v4  ;;  %v105_v38 = vrot.slane %v30_v7, %v104_v26  ;;  %v254_v39 = vld [vmem:[%s896_s5 + $0x8] sm:$0xff]  ;;  %v79_v42 = vsel %vm77_vm6, 1, %v684_v4  ;;  %vm87_vm7 = vcmp.eq.s32.totalorder %v85_v29, %v758_v10  ;;  %271 = vperm.xlu1 %661, %v255_v36   ;;  %v253_v47 = vld [vmem:[%s896_s5] sm:$0xff] }
   0xc   :  { %623 = vmatmul.mubr.msk.f32.gmra.mxu1 %vm289_vm0, %v247_v28  ;;  %v249_v40 = vld [vmem:[%s895_s4 + $0x28] sm:$0xff]  ;;  %v61_v41 = vadd.s32 %v59_v33, %v51_v34  ;;  %vm38_vm8 = vcmp.eq.s32.totalorder %v37_v19, %v745_v6  ;;  %vm46_vm9 = vcmp.eq.s32.totalorder %v45_v20, %v745_v6  ;;  %vm56_vm10 = vcmp.eq.s32.totalorder %v55_v21, %v745_v6  ;;  %v118_v50 = vld [vmem:[%s893_s2] sm:$0xff]  ;;  %v120_v5 = vld [vmem:[%s893_s2 + $0x10] sm:$0xff] }
   0xd   :  { %625 = vmatprep.mubr.msk.f32.mxu1 %vm289_vm0, %v248_v30  ;;  %v40_v43 = vsel %vm38_vm8, 1, %v684_v4  ;;  %vm66_vm11 = vcmp.eq.s32.totalorder %v65_v24, %v745_v6  ;;  %vm97_vm12 = vcmp.eq.s32.totalorder %v95_v35, %v758_v10  ;;  %v48_v45 = vsel %vm46_vm9, 1, %v684_v4  ;;  %266 = vperm.xlu0 %660, %v254_v39   ;;  %v119_v57 = vld [vmem:[%s893_s2 + $0x8] sm:$0xff]  ;;  %v413_v60 = vld [vmem:[%s898_s7] sm:$0xff]  ;;  %v121_v11 = vld [vmem:[%s893_s2 + $0x18] sm:$0xff] }
   0xe   :  { %v71_v44 = vadd.s32 %v69_v37, %v61_v41  ;;  %v58_v46 = vsel %vm56_vm10, 1, %v684_v4  ;;  %v89_v48 = vsel %vm87_vm7, 1, %v684_v4  ;;  %v50_v49 = vadd.s32 %v48_v45, %v40_v43  ;;  %v414_v2 = vld [vmem:[%s898_s7 + $0x8] sm:$0xff]  ;;  %v416_v13 = vld [vmem:[%s898_s7 + $0x18] sm:$0xff]  ;;  %v114_v14 = vld [vmem:[%s892_s1 + $0x10] sm:$0xff] }
   0xf   :  { %vm76_vm13 = vcmp.eq.s32.totalorder %v75_v25, %v745_v6  ;;  %vm107_vm14 = vcmp.eq.s32.totalorder %v105_v38, %v758_v10  ;;  %v68_v52 = vsel %vm66_vm11, 1, %v684_v4  ;;  %v99_v53 = vsel %vm97_vm12, 1, %v684_v4  ;;  %261 = vperm.xlu1 %661, %v253_v47   ;;  %v115_v15 = vld [vmem:[%s892_s1 + $0x18] sm:$0xff]  ;;  %v409_v16 = vld [vmem:[%s897_s6] sm:$0xff]  ;;  %v411_v17 = vld [vmem:[%s897_s6 + $0x10] sm:$0xff] }
  0x10   :  { %626 = vmatmul.mubr.msk.f32.gmra.mxu1 %vm289_vm0, %v249_v40  ;;  %v81_v51 = vadd.s32 %v79_v42, %v71_v44  ;;  %v60_v54 = vadd.s32 %v58_v46, %v50_v49  ;;  %vm86_vm15 = vcmp.eq.s32.totalorder %v85_v29, %v745_v6  ;;  %v78_v56 = vsel %vm76_vm13, 1, %v684_v4  ;;  %v410_v42 = vld [vmem:[%s897_s6 + $0x8] sm:$0xff]  ;;  %v412_v43 = vld [vmem:[%s897_s6 + $0x18] sm:$0xff]  ;;  %s685_s6 = smov [#allocation2]  }
  0x11   :  { %124 = vperm.xlu0 %660, %v118_v50   ;;  %v109_v58 = vsel %vm107_vm14, 1, %v684_v4  ;;  %vm96_vm0 = vcmp.eq.s32.totalorder %v95_v35, %v745_v6  ;;  %v88_v62 = vsel %vm86_vm15, 1, %v684_v4  ;;  %vm106_vm2 = vcmp.eq.s32.totalorder %v105_v38, %v745_v6  ;;  %v415_v6 = vld [vmem:[%s898_s7 + $0x10] sm:$0xff]  ;;  %s555_s15 = sshll.u32 %s685_s6, 4  ;;  %s556_s15 = int_to_ptr.vmem [resolvable:$true] %s555_s15 }
  0x12   :  { %v91_v55 = vadd.s32 %v89_v48, %v81_v51  ;;  %v70_v59 = vadd.s32 %v68_v52, %v60_v54  ;;  %v98_v1 = vsel %vm96_vm0, 1, %v684_v4  ;;  %vm155_vm3 = vcmask 1041408   ;;  %s662_s5 = scalar_lea.vmem %s556_s15, 16  ;;  %s666_s16 = scalar_lea.vmem %s556_s15, 32 }
  0x13   :  { %129 = vperm.xlu1 %661, %v119_v57   ;;  %v108_v8 = vsel %vm106_vm2, 1, %v684_v4  ;;  %v113_v4 = vld [vmem:[%s892_s1 + $0x8] sm:$0xff]  ;;  %vm437_vm4 = vcmask 392192   ;;  %p663_p0 = scmp.ne.s32.totalorder %s556_s15, %s662_s5  ;;  %p667_p1 = scmp.lt.s32.totalorder %s556_s15, %s556_s15 }
  0x14   :  { %v101_v61 = vadd.s32 %v99_v53, %v91_v55  ;;  %v80_v63 = vadd.s32 %v78_v56, %v70_v59  ;;  %643 = vmatprep.mubr.msk.f32.mxu1 %vm437_vm4, %v411_v17  ;;  %p668_p2 = scmp.lt.s32.totalorder %s666_s16, %s662_s5 }
  0x15   :  { %419 = vperm.xlu0 %660, %v413_v60  }
  0x16   :  { %v111_v0 = vadd.s32 %v109_v58, %v101_v61  ;;  %v90_v3 = vadd.s32 %v88_v62, %v80_v63  ;;  %p669_p3 = por %p668_p2, %p667_p1 }
  0x17   :  { %424 = vperm.xlu1 %661, %v414_v2  }
  0x18   :  { %v117_v7 = vcvt.s32.f32 %v111_v0  ;;  %v100_v9 = vadd.s32 %v98_v1, %v90_v3  ;;  %p670_p4 = pnand %p669_p3, %p663_p0 }
  0x19   :  { %134 = vperm.xlu0 %660, %v120_v5  }
  0x1a   :  { %603 = vmatprep.subr.msk.mxu0 %vm155_vm3, %v117_v7  ;;  %v110_v10 = vadd.s32 %v108_v8, %v100_v9 }
  0x1b   :  { %604 = vmatpush3.msk.msra.mxu0 %vm155_vm3, %v117_v7  ;;  %429 = vperm.xlu1 %661, %v415_v6  }
  0x1c   :  { %v116_v12 = vcvt.s32.f32 %v110_v10 }
  0x1d   :  { %139 = vperm.xlu0 %660, %v121_v11  }
  0x1e   :  { %605 = vmatprep.subr.mxu0 %v116_v12 }
  0x1f   :  { %606 = vmatpush3.msra.mxu0 %v116_v12  ;;  %434 = vperm.xlu1 %661, %v416_v13  }
  0x20   :  { %608 = vmatmul.mubr.msk.f32.vlgmr.msra.gmra.mxu0 %vm142_vm1, %v113_v4 }
  0x21   :  { %610 = vmatprep.mubr.msk.f32.mxu0 %vm142_vm1, %v114_v14 }
  0x24   :  { %611 = vmatmul.mubr.msk.f32.gmra.mxu0 %vm142_vm1, %v115_v15 }
  0x25   :  { %640 = vmatprep.mubr.msk.f32.mxu0 %vm437_vm4, %v409_v16 }
  0x7f   :  { %v287_v19 = vpop.permute.xlu0 %286 }
  0x81   :  { %v277_v21 = vpop.permute.xlu1 %276 }
  0x83   :  { %v282_v24 = vpop.permute.xlu0 %281 }
  0x86   :  { %v272_v27 = vpop.permute.xlu1 %271 }
  0x88   :  { %v267_v34 = vpop.permute.xlu0 %266 }
  0x8a   :  { %v262_v37 = vpop.permute.xlu1 %261 }
  0x8c   :  { %v125_v46 = vpop.permute.xlu0 %124 }
  0x8e   :  { %v130_v44 = vpop.permute.xlu1 %129 }
  0x90   :  { %v420_v49 = vpop.permute.xlu0 %419 }
  0x92   :  { %v425_v48 = vpop.permute.xlu1 %424 }
  0x94   :  { %v135_v53 = vpop.permute.xlu0 %134 }
  0x96   :  { %v430_v51 = vpop.permute.xlu1 %429 }
  0x98   :  { %v140_v5 = vpop.permute.xlu0 %139 }
  0x9a   :  { %v435_v63 = vpop.permute.xlu1 %434 }
  0xc8   :  { %v621_v18 = vpop.f32.mrf.mxu1 }
  0xc9   :  { %v380_v35 = vadd.f32 %v621_v18, %v267_v34 }
  0xca   :  { %v374_v20 = vpop.f32.mrf.mxu1 }
  0xcb   :  { %v375_v38 = vadd.f32 %v374_v20, %v262_v37  ;;  %v404_v40 = vmax.f32 %v380_v35, 0.0 }
  0xcc   :  { %v624_v22 = vpop.f32.mrf.mxu1 }
  0xcd   :  { %v390_v29 = vadd.f32 %v624_v22, %v277_v21  ;;  %v403_v41 = vmax.f32 %v375_v38, 0.0 }
  0xce   :  { %v384_v23 = vpop.f32.mrf.mxu1 }
  0xcf   :  { %v385_v32 = vadd.f32 %v384_v23, %v272_v27  ;;  %v406_v36 = vmax.f32 %v390_v29, 0.0 }
  0xd0   :  { %v627_v25 = vpop.f32.mrf.mxu1 }
  0xd1   :  { %v400_v26 = vadd.f32 %v627_v25, %v287_v19  ;;  %v405_v39 = vmax.f32 %v385_v32, 0.0 }
  0xd2   :  { %v394_v28 = vpop.f32.mrf.mxu1 }
  0xd3   :  { %v408_v30 = vmax.f32 %v400_v26, 0.0  ;;  %v395_v31 = vadd.f32 %v394_v28, %v282_v24 }
  0xd5   :  { %v407_v33 = vmax.f32 %v395_v31, 0.0  ;;  %628 = vmatprep.subr.mxu0 %v408_v30  ;;  %646 = vmatprep.subr.mxu1 %v408_v30 }
  0xd6   :  { %629 = vmatpush3.msra.mxu0 %v408_v30  ;;  %652 = vmatpush3.msra.mxu1 %v408_v30 }
  0xd7   :  { %630 = vmatprep.subr.mxu0 %v407_v33  ;;  %647 = vmatprep.subr.mxu1 %v407_v33 }
  0xd8   :  { %631 = vmatpush3.msra.mxu0 %v407_v33  ;;  %653 = vmatpush3.msra.mxu1 %v407_v33 }
  0xd9   :  { %632 = vmatprep.subr.mxu0 %v406_v36  ;;  %648 = vmatprep.subr.mxu1 %v406_v36 }
  0xda   :  { %633 = vmatpush3.msra.mxu0 %v406_v36  ;;  %654 = vmatpush3.msra.mxu1 %v406_v36 }
  0xdb   :  { %634 = vmatprep.subr.mxu0 %v405_v39  ;;  %649 = vmatprep.subr.mxu1 %v405_v39 }
  0xdc   :  { %635 = vmatpush3.msra.mxu0 %v405_v39  ;;  %655 = vmatpush3.msra.mxu1 %v405_v39 }
  0xdd   :  { %636 = vmatprep.subr.mxu0 %v404_v40  ;;  %650 = vmatprep.subr.mxu1 %v404_v40 }
  0xde   :  { %637 = vmatpush3.msra.mxu0 %v404_v40  ;;  %656 = vmatpush3.msra.mxu1 %v404_v40 }
  0xdf   :  { %638 = vmatprep.subr.mxu0 %v403_v41  ;;  %651 = vmatprep.subr.mxu1 %v403_v41 }
  0xe0   :  { %639 = vmatpush3.msra.mxu0 %v403_v41  ;;  %657 = vmatpush3.msra.mxu1 %v403_v41  ;;  %v609_v45 = vpop.f32.mrf.mxu0 }
  0xe1   :  { %641 = vmatmul.mubr.msk.f32.vlgmr.msra.gmra.mxu0 %vm437_vm4, %v410_v42  ;;  %644 = vmatmul.mubr.msk.f32.vlgmr.msra.gmra.mxu1 %vm437_vm4, %v412_v43  ;;  %v231_v59 = vadd.f32 %v609_v45, %v130_v44 }
  0xe2   :  { %v225_v47 = vpop.f32.mrf.mxu0 }
  0xe3   :  { %v226_v60 = vadd.f32 %v225_v47, %v125_v46 }
  0xe4   :  { %v612_v50 = vpop.f32.mrf.mxu0 }
  0xe5   :  { %v241_v7 = vadd.f32 %v612_v50, %v140_v5 }
  0xe6   :  { %v235_v52 = vpop.f32.mrf.mxu0 }
  0xe7   :  { %v236_v0 = vadd.f32 %v235_v52, %v135_v53 }
 0x1a1   :  { %v642_v54 = vpop.f32.mrf.mxu0  ;;  %v645_v55 = vpop.f32.mrf.mxu1 }
 0x1a2   :  { %v522_v56 = vadd.f32 %v642_v54, %v425_v48  ;;  %v532_v2 = vadd.f32 %v645_v55, %v435_v63 }
 0x1a3   :  { %v516_v57 = vpop.f32.mrf.mxu0  ;;  %v526_v58 = vpop.f32.mrf.mxu1 }
 0x1a4   :  { %v517_v61 = vadd.f32 %v516_v57, %v420_v49  ;;  %v527_v62 = vadd.f32 %v526_v58, %v430_v51  ;;  %v536_v1 = vmul.f32 %v522_v56, %v231_v59  ;;  %v538_v6 = vmul.f32 %v532_v2, %v241_v7 }
 0x1a6   :  { %v535_v3 = vmul.f32 %v517_v61, %v226_v60  ;;  %v537_v9 = vmul.f32 %v527_v62, %v236_v0 }
 0x1a8   :  { %v539_v8 = vadd.f32 %v536_v1, %v535_v3 }
 0x1aa   :  { %v540_v10 = vadd.f32 %v539_v8, %v537_v9 }
 0x1ac   :  { %v541_v11 = vadd.f32 %v540_v10, %v538_v6 }
 0x1ae   :  { %v542_v12 = vrot.slane %v541_v11, 4 }
 0x1b0   :  { %v543_v4 = vadd.f32 %v542_v12, %v541_v11 }
 0x1b2   :  { %v544_v13 = vrot.slane %v543_v4, 2 }
 0x1b4   :  { %v545_v14 = vadd.f32 %v544_v13, %v543_v4 }
 0x1b6   :  { %v546_v15 = vrot.slane %v545_v14, 1 }
 0x1b8   :  { %v547_v16 = vadd.f32 %v546_v15, %v545_v14 }
 0x1ba   :  { %548 = vst [vmem:[#allocation2] sm:$0x1] %v547_v16 }
 0x1bb   :  { %673 = shalt.err (!%p670_p4)
}
 0x1bc   :  { %558 = dma.vmem_to_hbm [thread:$0]  %s556_s15, 16, %s899_s8, [#allocation3]  }
 0x1bd   :  { %682 = dma.done.wait [#allocation3], 16  }
 0x1be   :  { %683 = vsyncadd [#allocation3], 4294967280 }
 0x1bf   :  { %562 = vsyncpa [#allocation3], 1 }

</bundles_post_ra>
